<compile_context>
chip_gen: v6e
topology: v6e:2x2x1
jax: 0.10.0
libtpu: 0.0.40
codegen_flags: <defaults>
</compile_context>

<pallas_src>
import functools
import math

import jax
import jax.numpy as jnp
from jax import lax
from jax.experimental import pallas as pl
from jax.experimental.pallas import tpu as pltpu


# ----------------------------------------------------------------------------
# Kernel
# ----------------------------------------------------------------------------
def _make_kernel(num_layers: int):
    n_layer_refs = 4 + 3 * (num_layers - 1)          # layer 0 has split w_ih
    n_in = 4 + n_layer_refs + 2                      # x, h0, c0, enc, layers, fc_w, fc_b

    def kernel(*refs):
        in_refs = refs[:n_in]
        out_seq_ref, h_out_ref, c_out_ref, attn_seq_ref = refs[n_in:n_in + 4]
        h_state, c_state = refs[n_in + 4:n_in + 6]   # VMEM scratch, persistent over T

        x_ref, h0_ref, c0_ref, enc_ref = in_refs[:4]
        layer_refs = in_refs[4:4 + n_layer_refs]
        fc_w_ref, fc_b_ref = in_refs[4 + n_layer_refs:n_in]

        t = pl.program_id(0)
        f32 = jnp.float32

        # ---- step 0: load initial state into resident VMEM scratch ----
        @pl.when(t == 0)
        def _init():
            h_state[...] = h0_ref[...]
            c_state[...] = c0_ref[...]

        enc = enc_ref[...]                           # (B, S, H), resident in VMEM
        B, S, H = enc.shape

        # ---- Attention (decode, q = 1): batched MXU matmuls ----
        q = h_state[num_layers - 1][:, None, :]      # (B, 1, H)
        scores = lax.dot_general(                    # (B, 1, S)
            q, enc, (((2,), (2,)), ((0,), (0,))),
            preferred_element_type=f32)
        m = jnp.max(scores, axis=-1, keepdims=True)
        e = jnp.exp(scores - m)
        denom = jnp.sum(e, axis=-1, keepdims=True)
        attn = e * pl.reciprocal(denom, approx=True)  # softmax, EUP reciprocal
        attn_seq_ref[0] = attn[:, 0, :]               # (B, S) per-step output

        context = lax.dot_general(                    # (B, 1, H) -> (B, H)
            attn, enc, (((2,), (1,)), ((0,), (0,))),
            preferred_element_type=f32)[:, 0, :]

        # ---- LSTM stack (single time step) ----
        x = x_ref[0]                                  # (B, H) f32
        idx = 0
        for l in range(num_layers):
            h_prev = h_state[l]                       # (B, H)
            c_prev = c_state[l]                       # (B, H)
            if l == 0:
                # concat-free layer 0: split input weight into x / context parts
                w_x = layer_refs[idx][...].astype(f32)
                w_c = layer_refs[idx + 1][...].astype(f32)
                w_hh = layer_refs[idx + 2][...].astype(f32)
                b = layer_refs[idx + 3][...]
                idx += 4
                gates = (jnp.dot(x, w_x, preferred_element_type=f32)
                         + jnp.dot(context, w_c, preferred_element_type=f32)
                         + jnp.dot(h_prev, w_hh, preferred_element_type=f32)
                         + b)
            else:
                w_ih = layer_refs[idx][...].astype(f32)
                w_hh = layer_refs[idx + 1][...].astype(f32)
                b = layer_refs[idx + 2][...]
                idx += 3
                gates = (jnp.dot(x, w_ih, preferred_element_type=f32)
                         + jnp.dot(h_prev, w_hh, preferred_element_type=f32)
                         + b)
            i_g = jax.nn.sigmoid(gates[:, 0 * H:1 * H])
            f_g = jax.nn.sigmoid(gates[:, 1 * H:2 * H])
            g_g = jnp.tanh(gates[:, 2 * H:3 * H])
            o_g = jax.nn.sigmoid(gates[:, 3 * H:4 * H])
            c_new = f_g * c_prev + i_g * g_g
            h_new = o_g * jnp.tanh(c_new)
            h_state[l] = h_new
            c_state[l] = c_new
            x = h_new

        # ---- Final FC on last-layer output (per step) ----
        out_seq_ref[0] = (jnp.dot(x, fc_w_ref[...].astype(f32),
                                  preferred_element_type=f32)
                          + fc_b_ref[...])

        # ---- last step: write final state back (aliased onto the inputs) ----
        @pl.when(t == pl.num_programs(0) - 1)
        def _finalize():
            h_out_ref[...] = h_state[...]
            c_out_ref[...] = c_state[...]

    return kernel


# ----------------------------------------------------------------------------
# Wrappers
# ----------------------------------------------------------------------------
def _const_spec(shape):
    """Whole-array block, constant across the T grid axis (loaded once)."""
    nd = len(shape)
    return pl.BlockSpec(shape, lambda t, _nd=nd: (0,) * _nd)


@functools.partial(jax.jit, static_argnames=("num_layers",))
def decoder_decode(x_seq, hidden, cell, encoder_outputs, kernel_params, num_layers):
    """Runs T fused decode steps (== T sequential module.forward calls).

    x_seq           : (T, B, H)   per-step inputs
    hidden, cell    : (L, B, H)   initial LSTM state
    encoder_outputs : (B, S, H)
    kernel_params   : prepare_params(...) output (bf16 weight mats, f32 biases)
    Returns (out_seq (T,B,O), hidden (L,B,H), cell (L,B,H), attn_seq (T,B,S)).
    """
    T, B, H = x_seq.shape
    L = hidden.shape[0]
    S = encoder_outputs.shape[1]
    O = kernel_params[-1].shape[-1]

    inputs = [x_seq, hidden, cell, encoder_outputs] + list(kernel_params)

    in_specs = [
        pl.BlockSpec((1, B, H), lambda t: (t, 0, 0)),   # per-step input
        _const_spec(hidden.shape),                      # initial h (read at t==0)
        _const_spec(cell.shape),                        # initial c
        _const_spec(encoder_outputs.shape),             # enc, resident
    ] + [_const_spec(p.shape) for p in kernel_params]   # weights, resident

    out_shapes = (
        jax.ShapeDtypeStruct((T, B, O), jnp.float32),
        jax.ShapeDtypeStruct((L, B, H), jnp.float32),
        jax.ShapeDtypeStruct((L, B, H), jnp.float32),
        jax.ShapeDtypeStruct((T, B, S), jnp.float32),
    )
    out_specs = (
        pl.BlockSpec((1, B, O), lambda t: (t, 0, 0)),
        pl.BlockSpec((L, B, H), lambda t: (0, 0, 0)),
        pl.BlockSpec((L, B, H), lambda t: (0, 0, 0)),
        pl.BlockSpec((1, B, S), lambda t: (t, 0, 0)),
    )

    fn = pl.pallas_call(
        _make_kernel(num_layers),
        grid=(T,),
        out_shape=out_shapes,
        in_specs=in_specs,
        out_specs=out_specs,
        scratch_shapes=[pltpu.VMEM((L, B, H), jnp.float32),   # h state
                        pltpu.VMEM((L, B, H), jnp.float32)],  # c state
        input_output_aliases={1: 1, 2: 2},                    # hidden, cell in place
        compiler_params=pltpu.CompilerParams(
            dimension_semantics=("arbitrary",)),              # T steps are sequential
    )
    return fn(*inputs)


def decoder_step(x, hidden, cell, encoder_outputs, kernel_params, num_layers):
    """Exact single-step module.forward semantics (T == 1)."""
    out, h, c, attn = decoder_decode(x[None], hidden, cell, encoder_outputs,
                                     kernel_params, num_layers=num_layers)
    return out[0], h, c, attn[0]


# ----------------------------------------------------------------------------
# Parameters
# ----------------------------------------------------------------------------
def _uni(rng, shape, k):
    return jax.random.uniform(rng, shape, jnp.float32, -k, k)


def init_params(key, H, O, num_layers):
    """PyTorch-style U(-1/sqrt(H), 1/sqrt(H)) init; returns torch-layout params."""
    k = 1.0 / math.sqrt(H)
    ks = jax.random.split(key, 4 * num_layers + 2)
    ki = 0
    flat = []
    for l in range(num_layers):
        in_dim = 2 * H if l == 0 else H
        w_ih = _uni(ks[ki], (in_dim, 4 * H), k); ki += 1
        w_hh = _uni(ks[ki], (H, 4 * H), k); ki += 1
        b = _uni(ks[ki], (1, 4 * H), k) + _uni(ks[ki + 1], (1, 4 * H), k)  # b_ih + b_hh
        ki += 2
        flat += [w_ih, w_hh, b]
    fc_w = _uni(ks[ki], (H, O), k); ki += 1
    fc_b = _uni(ks[ki], (1, O), k); ki += 1
    return flat + [fc_w, fc_b]


def prepare_params(flat_params, num_layers, weight_dtype=jnp.bfloat16):
    """Split layer-0 w_ih (concat removal) and cast weight matrices to bf16."""
    H = flat_params[1].shape[0]   # w_hh_0 is (H, 4H)
    out = []
    for l in range(num_layers):
        w_ih, w_hh, b = flat_params[3 * l:3 * l + 3]
        if l == 0:
            out += [w_ih[:H].astype(weight_dtype), w_ih[H:].astype(weight_dtype)]
        else:
            out += [w_ih.astype(weight_dtype)]
        out += [w_hh.astype(weight_dtype), b.astype(jnp.float32)]
    fc_w, fc_b = flat_params[-2], flat_params[-1]
    out += [fc_w.astype(weight_dtype), fc_b.astype(jnp.float32)]
    return tuple(out)


# ----------------------------------------------------------------------------
# Pure-JAX reference (uses the same bf16-rounded weights as the kernel)
# ----------------------------------------------------------------------------
def _reference_step(x, hidden, cell, enc, kp, num_layers):
    f32 = jnp.float32
    H = hidden.shape[-1]
    scores = jnp.einsum("bsh,bh->bs", enc, hidden[-1])
    attn = jax.nn.softmax(scores, axis=-1)
    context = jnp.einsum("bs,bsh->bh", attn, enc)
    xx = x
    h_out, c_out = [], []
    idx = 0
    for l in range(num_layers):
        if l == 0:
            w_x = kp[idx].astype(f32); w_c = kp[idx + 1].astype(f32)
            w_hh = kp[idx + 2].astype(f32); b = kp[idx + 3]
            idx += 4
            gates = xx @ w_x + context @ w_c + hidden[l] @ w_hh + b
        else:
            w_ih = kp[idx].astype(f32); w_hh = kp[idx + 1].astype(f32)
            b = kp[idx + 2]
            idx += 3
            gates = xx @ w_ih + hidden[l] @ w_hh + b
        i = jax.nn.sigmoid(gates[:, :H])
        f = jax.nn.sigmoid(gates[:, H:2 * H])
        g = jnp.tanh(gates[:, 2 * H:3 * H])
        o = jax.nn.sigmoid(gates[:, 3 * H:])
        c_new = f * cell[l] + i * g
        h_new = o * jnp.tanh(c_new)
        h_out.append(h_new); c_out.append(c_new)
        xx = h_new
    out = xx @ kp[-2].astype(f32) + kp[-1]
    return out, jnp.stack(h_out), jnp.stack(c_out), attn


def _reference_decode(x_seq, hidden, cell, enc, kp, num_layers):
    outs, attns = [], []
    for t in range(x_seq.shape[0]):
        o, hidden, cell, a = _reference_step(x_seq[t], hidden, cell, enc, kp, num_layers)
        outs.append(o); attns.append(a)
    return jnp.stack(outs), hidden, cell, jnp.stack(attns)


# ----------------------------------------------------------------------------
# Test
# ----------------------------------------------------------------------------
if __name__ == "__main__":
    B, S, H, L, O, T = 2, 8, 32, 2, 16, 6

    key = jax.random.PRNGKey(0)
    kp_key, kx, kh, kc, ke = jax.random.split(key, 5)

    flat = init_params(kp_key, H, O, L)
    kparams = prepare_params(flat, L)                 # bf16 mats, f32 biases

    x_seq = jax.random.normal(kx, (T, B, H), jnp.float32)
    hidden = jax.random.normal(kh, (L, B, H), jnp.float32)
    cell = jax.random.normal(kc, (L, B, H), jnp.float32)
    enc = jax.random.normal(ke, (B, S, H), jnp.float32)

    # Tolerance covers the approximate-reciprocal softmax and accumulation
    # order differences (weights are identically bf16-rounded on both sides).
    TOL = dict(atol=5e-3, rtol=5e-3)

    # --- single decode step: exact module.forward semantics ---
    out1, h1, c1, attn1 = decoder_step(x_seq[0], hidden, cell, enc, kparams, L)
    jax.block_until_ready((out1, h1, c1, attn1))
    r_out, r_h, r_c, r_attn = _reference_step(x_seq[0], hidden, cell, enc, kparams, L)
    assert jnp.allclose(out1, r_out, **TOL)
    assert jnp.allclose(h1, r_h, **TOL)
    assert jnp.allclose(c1, r_c, **TOL)
    assert jnp.allclose(attn1, r_attn, **TOL)

    # --- fused T-step decode (== T sequential forward calls) ---
    out_seq, hT, cT, attn_seq = decoder_decode(x_seq, hidden, cell, enc,
                                               kparams, num_layers=L)
    jax.block_until_ready((out_seq, hT, cT, attn_seq))
    r_out_seq, r_hT, r_cT, r_attn_seq = _reference_decode(
        x_seq, hidden, cell, enc, kparams, L)
    assert jnp.allclose(out_seq, r_out_seq, **TOL)
    assert jnp.allclose(hT, r_hT, **TOL)
    assert jnp.allclose(cT, r_cT, **TOL)
    assert jnp.allclose(attn_seq, r_attn_seq, **TOL)

    print("KERNEL_OK")
</pallas_src>

<mosaic_0001>
module attributes {stable_mosaic.version = 11 : i64} {
  func.func @kernel(%arg0: i32, %arg1: memref<1x2x32xf32, #tpu.memory_space<vmem>>, %arg2: memref<2x2x32xf32, #tpu.memory_space<vmem>>, %arg3: memref<2x2x32xf32, #tpu.memory_space<vmem>>, %arg4: memref<2x8x32xf32, #tpu.memory_space<vmem>>, %arg5: memref<32x128xbf16, #tpu.memory_space<vmem>>, %arg6: memref<32x128xbf16, #tpu.memory_space<vmem>>, %arg7: memref<32x128xbf16, #tpu.memory_space<vmem>>, %arg8: memref<1x128xf32, #tpu.memory_space<vmem>>, %arg9: memref<32x128xbf16, #tpu.memory_space<vmem>>, %arg10: memref<32x128xbf16, #tpu.memory_space<vmem>>, %arg11: memref<1x128xf32, #tpu.memory_space<vmem>>, %arg12: memref<32x16xbf16, #tpu.memory_space<vmem>>, %arg13: memref<1x16xf32, #tpu.memory_space<vmem>>, %arg14: memref<1x2x16xf32, #tpu.memory_space<vmem>>, %arg15: memref<2x2x32xf32, #tpu.memory_space<vmem>>, %arg16: memref<2x2x32xf32, #tpu.memory_space<vmem>>, %arg17: memref<1x2x8xf32, #tpu.memory_space<vmem>>, %arg18: memref<2x2x32xf32, #tpu.memory_space<vmem>>, %arg19: memref<2x2x32xf32, #tpu.memory_space<vmem>>) attributes {dimension_semantics = [#tpu.dimension_semantics<arbitrary>], iteration_bounds = array<i64: 1>, scalar_prefetch = 0 : i64, scratch_operands = 2 : i64, tpu.core_type = #tpu.core_type<tc>, window_params = [{transform_indices = @transform_0, window_bounds = array<i64: 1, 2, 32>}, {pipeline_mode = #tpu.pipeline_mode<synchronous>, transform_indices = @transform_1, window_bounds = array<i64: 2, 2, 32>}, {pipeline_mode = #tpu.pipeline_mode<synchronous>, transform_indices = @transform_2, window_bounds = array<i64: 2, 2, 32>}, {pipeline_mode = #tpu.pipeline_mode<synchronous>, transform_indices = @transform_3, window_bounds = array<i64: 2, 8, 32>}, {pipeline_mode = #tpu.pipeline_mode<synchronous>, transform_indices = @transform_4, window_bounds = array<i64: 32, 128>}, {pipeline_mode = #tpu.pipeline_mode<synchronous>, transform_indices = @transform_5, window_bounds = array<i64: 32, 128>}, {pipeline_mode = #tpu.pipeline_mode<synchronous>, transform_indices = @transform_6, window_bounds = array<i64: 32, 128>}, {pipeline_mode = #tpu.pipeline_mode<synchronous>, transform_indices = @transform_7, window_bounds = array<i64: 1, 128>}, {pipeline_mode = #tpu.pipeline_mode<synchronous>, transform_indices = @transform_8, window_bounds = array<i64: 32, 128>}, {pipeline_mode = #tpu.pipeline_mode<synchronous>, transform_indices = @transform_9, window_bounds = array<i64: 32, 128>}, {pipeline_mode = #tpu.pipeline_mode<synchronous>, transform_indices = @transform_10, window_bounds = array<i64: 1, 128>}, {pipeline_mode = #tpu.pipeline_mode<synchronous>, transform_indices = @transform_11, window_bounds = array<i64: 32, 16>}, {pipeline_mode = #tpu.pipeline_mode<synchronous>, transform_indices = @transform_12, window_bounds = array<i64: 1, 16>}, {transform_indices = @transform_13, window_bounds = array<i64: 1, 2, 16>}, {pipeline_mode = #tpu.pipeline_mode<synchronous>, transform_indices = @transform_14, window_bounds = array<i64: 2, 2, 32>}, {pipeline_mode = #tpu.pipeline_mode<synchronous>, transform_indices = @transform_15, window_bounds = array<i64: 2, 2, 32>}, {transform_indices = @transform_16, window_bounds = array<i64: 1, 2, 8>}]} {
    %c0_i32 = arith.constant 0 : i32
    %0 = arith.cmpi eq, %arg0, %c0_i32 : i32
    %1 = arith.extui %0 : i1 to i32
    %c0_i32_0 = arith.constant 0 : i32
    %2 = arith.cmpi ne, %1, %c0_i32_0 : i32
    scf.if %2 {
      %c0_73 = arith.constant 0 : index
      %c0_74 = arith.constant 0 : index
      %c0_75 = arith.constant 0 : index
      %132 = vector.load %arg2[%c0_73, %c0_74, %c0_75] : memref<2x2x32xf32, #tpu.memory_space<vmem>>, vector<2x2x32xf32>
      %c0_76 = arith.constant 0 : index
      %c0_77 = arith.constant 0 : index
      %c0_78 = arith.constant 0 : index
      %133 = vector.load %arg18[%c0_76, %c0_77, %c0_78] : memref<2x2x32xf32, #tpu.memory_space<vmem>>, vector<2x2x32xf32>
      tpu.vector_store %arg18[%c0_76, %c0_77, %c0_78], %132 {strides = array<i32>} : memref<2x2x32xf32, #tpu.memory_space<vmem>>, vector<2x2x32xf32>,
      %c0_79 = arith.constant 0 : index
      %c0_80 = arith.constant 0 : index
      %c0_81 = arith.constant 0 : index
      %134 = vector.load %arg3[%c0_79, %c0_80, %c0_81] : memref<2x2x32xf32, #tpu.memory_space<vmem>>, vector<2x2x32xf32>
      %c0_82 = arith.constant 0 : index
      %c0_83 = arith.constant 0 : index
      %c0_84 = arith.constant 0 : index
      %135 = vector.load %arg19[%c0_82, %c0_83, %c0_84] : memref<2x2x32xf32, #tpu.memory_space<vmem>>, vector<2x2x32xf32>
      tpu.vector_store %arg19[%c0_82, %c0_83, %c0_84], %134 {strides = array<i32>} : memref<2x2x32xf32, #tpu.memory_space<vmem>>, vector<2x2x32xf32>,
    } else {
    }
    %c0 = arith.constant 0 : index
    %c0_1 = arith.constant 0 : index
    %c0_2 = arith.constant 0 : index
    %3 = vector.load %arg4[%c0, %c0_1, %c0_2] : memref<2x8x32xf32, #tpu.memory_space<vmem>>, vector<2x8x32xf32>
    %c1 = arith.constant 1 : index
    %c0_3 = arith.constant 0 : index
    %c0_4 = arith.constant 0 : index
    %4 = vector.load %arg18[%c1, %c0_3, %c0_4] : memref<2x2x32xf32, #tpu.memory_space<vmem>>, vector<1x2x32xf32>
    %5 = vector.shape_cast %4 : vector<1x2x32xf32> to vector<2x32xf32>
    %6 = vector.shape_cast %5 : vector<2x32xf32> to vector<2x1x32xf32>
    %cst = arith.constant dense<0.000000e+00> : vector<2x1x8xf32>
    %7 = tpu.matmul %6, %3, %cst {dimension_numbers = #tpu.dot_dimension_numbers<[2], [2], [1], [1], [0, 0, 0, 1, 1, 1], [0], [0]>} : vector<2x1x32xf32>, vector<2x8x32xf32>, vector<2x1x8xf32> -> vector<2x1x8xf32>
    %cst_5 = arith.constant dense<0xFF800000> : vector<2x1xf32>
    %8 = vector.multi_reduction <maximumf>, %7, %cst_5 [2] : vector<2x1x8xf32> to vector<2x1xf32>
    %9 = vector.shape_cast %8 : vector<2x1xf32> to vector<2x1x1xf32>
    %10 = vector.broadcast %9 : vector<2x1x1xf32> to vector<2x1x8xf32>
    %11 = arith.subf %7, %10 : vector<2x1x8xf32>
    %12 = math.exp %11 : vector<2x1x8xf32>
    %cst_6 = arith.constant dense<0.000000e+00> : vector<2x1xf32>
    %13 = vector.multi_reduction <add>, %12, %cst_6 [2] : vector<2x1x8xf32> to vector<2x1xf32>
    %14 = vector.shape_cast %13 : vector<2x1xf32> to vector<2x1x1xf32>
    %15 = tpu.reciprocal %14 {approx = true} : vector<2x1x1xf32> -> vector<2x1x1xf32>
    %16 = vector.broadcast %15 : vector<2x1x1xf32> to vector<2x1x8xf32>
    %17 = arith.mulf %12, %16 : vector<2x1x8xf32>
    %18 = vector.shape_cast %17 : vector<2x1x8xf32> to vector<2x8xf32>
    %c0_7 = arith.constant 0 : index
    %c0_8 = arith.constant 0 : index
    %c0_9 = arith.constant 0 : index
    %19 = vector.load %arg17[%c0_7, %c0_8, %c0_9] : memref<1x2x8xf32, #tpu.memory_space<vmem>>, vector<1x2x8xf32>
    %20 = vector.shape_cast %19 : vector<1x2x8xf32> to vector<2x8xf32>
    %21 = vector.shape_cast %18 : vector<2x8xf32> to vector<1x2x8xf32>
    tpu.vector_store %arg17[%c0_7, %c0_8, %c0_9], %21 {strides = array<i32>} : memref<1x2x8xf32, #tpu.memory_space<vmem>>, vector<1x2x8xf32>,
    %cst_10 = arith.constant dense<0.000000e+00> : vector<2x1x32xf32>
    %22 = tpu.matmul %17, %3, %cst_10 {dimension_numbers = #tpu.dot_dimension_numbers<[2], [1], [1], [2], [0, 0, 0, 1, 1, 2], [0], [0]>} : vector<2x1x8xf32>, vector<2x8x32xf32>, vector<2x1x32xf32> -> vector<2x1x32xf32>
    %23 = vector.shape_cast %22 : vector<2x1x32xf32> to vector<2x32xf32>
    %c0_11 = arith.constant 0 : index
    %c0_12 = arith.constant 0 : index
    %c0_13 = arith.constant 0 : index
    %24 = vector.load %arg1[%c0_11, %c0_12, %c0_13] : memref<1x2x32xf32, #tpu.memory_space<vmem>>, vector<1x2x32xf32>
    %25 = vector.shape_cast %24 : vector<1x2x32xf32> to vector<2x32xf32>
    %c0_14 = arith.constant 0 : index
    %c0_15 = arith.constant 0 : index
    %c0_16 = arith.constant 0 : index
    %26 = vector.load %arg18[%c0_14, %c0_15, %c0_16] : memref<2x2x32xf32, #tpu.memory_space<vmem>>, vector<1x2x32xf32>
    %27 = vector.shape_cast %26 : vector<1x2x32xf32> to vector<2x32xf32>
    %c0_17 = arith.constant 0 : index
    %c0_18 = arith.constant 0 : index
    %c0_19 = arith.constant 0 : index
    %28 = vector.load %arg19[%c0_17, %c0_18, %c0_19] : memref<2x2x32xf32, #tpu.memory_space<vmem>>, vector<1x2x32xf32>
    %29 = vector.shape_cast %28 : vector<1x2x32xf32> to vector<2x32xf32>
    %c0_20 = arith.constant 0 : index
    %c0_21 = arith.constant 0 : index
    %30 = vector.load %arg5[%c0_20, %c0_21] : memref<32x128xbf16, #tpu.memory_space<vmem>>, vector<32x128xbf16>
    %31 = arith.extf %30 : vector<32x128xbf16> to vector<32x128xf32>
    %c0_22 = arith.constant 0 : index
    %c0_23 = arith.constant 0 : index
    %32 = vector.load %arg6[%c0_22, %c0_23] : memref<32x128xbf16, #tpu.memory_space<vmem>>, vector<32x128xbf16>
    %33 = arith.extf %32 : vector<32x128xbf16> to vector<32x128xf32>
    %c0_24 = arith.constant 0 : index
    %c0_25 = arith.constant 0 : index
    %34 = vector.load %arg7[%c0_24, %c0_25] : memref<32x128xbf16, #tpu.memory_space<vmem>>, vector<32x128xbf16>
    %35 = arith.extf %34 : vector<32x128xbf16> to vector<32x128xf32>
    %c0_26 = arith.constant 0 : index
    %c0_27 = arith.constant 0 : index
    %36 = vector.load %arg8[%c0_26, %c0_27] : memref<1x128xf32, #tpu.memory_space<vmem>>, vector<1x128xf32>
    %cst_28 = arith.constant dense<0.000000e+00> : vector<2x128xf32>
    %37 = tpu.matmul %25, %31, %cst_28 {dimension_numbers = #tpu.dot_dimension_numbers<[1], [0], [0], [1], [0, 0, 1, 1], [], []>} : vector<2x32xf32>, vector<32x128xf32>, vector<2x128xf32> -> vector<2x128xf32>
    %cst_29 = arith.constant dense<0.000000e+00> : vector<2x128xf32>
    %38 = tpu.matmul %23, %33, %cst_29 {dimension_numbers = #tpu.dot_dimension_numbers<[1], [0], [0], [1], [0, 0, 1, 1], [], []>} : vector<2x32xf32>, vector<32x128xf32>, vector<2x128xf32> -> vector<2x128xf32>
    %39 = arith.addf %37, %38 : vector<2x128xf32>
    %cst_30 = arith.constant dense<0.000000e+00> : vector<2x128xf32>
    %40 = tpu.matmul %27, %35, %cst_30 {dimension_numbers = #tpu.dot_dimension_numbers<[1], [0], [0], [1], [0, 0, 1, 1], [], []>} : vector<2x32xf32>, vector<32x128xf32>, vector<2x128xf32> -> vector<2x128xf32>
    %41 = arith.addf %39, %40 : vector<2x128xf32>
    %42 = vector.broadcast %36 : vector<1x128xf32> to vector<2x128xf32>
    %43 = arith.addf %41, %42 : vector<2x128xf32>
    %44 = vector.extract_strided_slice %43 {offsets = [0, 0], sizes = [2, 32], strides = [1, 1]} : vector<2x128xf32> to vector<2x32xf32>
    %45 = arith.negf %44 : vector<2x32xf32>
    %46 = math.exp %45 : vector<2x32xf32>
    %cst_31 = arith.constant 1.000000e+00 : f32
    %47 = vector.broadcast %cst_31 : f32 to vector<2x32xf32>
    %48 = arith.addf %47, %46 : vector<2x32xf32>
    %49 = arith.divf %47, %48 : vector<2x32xf32>
    %50 = vector.extract_strided_slice %43 {offsets = [0, 32], sizes = [2, 32], strides = [1, 1]} : vector<2x128xf32> to vector<2x32xf32>
    %51 = arith.negf %50 : vector<2x32xf32>
    %52 = math.exp %51 : vector<2x32xf32>
    %cst_32 = arith.constant 1.000000e+00 : f32
    %53 = vector.broadcast %cst_32 : f32 to vector<2x32xf32>
    %54 = arith.addf %53, %52 : vector<2x32xf32>
    %55 = arith.divf %53, %54 : vector<2x32xf32>
    %56 = vector.extract_strided_slice %43 {offsets = [0, 64], sizes = [2, 32], strides = [1, 1]} : vector<2x128xf32> to vector<2x32xf32>
    %57 = math.tanh %56 : vector<2x32xf32>
    %58 = vector.extract_strided_slice %43 {offsets = [0, 96], sizes = [2, 32], strides = [1, 1]} : vector<2x128xf32> to vector<2x32xf32>
    %59 = arith.negf %58 : vector<2x32xf32>
    %60 = math.exp %59 : vector<2x32xf32>
    %cst_33 = arith.constant 1.000000e+00 : f32
    %61 = vector.broadcast %cst_33 : f32 to vector<2x32xf32>
    %62 = arith.addf %61, %60 : vector<2x32xf32>
    %63 = arith.divf %61, %62 : vector<2x32xf32>
    %64 = arith.mulf %55, %29 : vector<2x32xf32>
    %65 = arith.mulf %49, %57 : vector<2x32xf32>
    %66 = arith.addf %64, %65 : vector<2x32xf32>
    %67 = math.tanh %66 : vector<2x32xf32>
    %68 = arith.mulf %63, %67 : vector<2x32xf32>
    %c0_34 = arith.constant 0 : index
    %c0_35 = arith.constant 0 : index
    %c0_36 = arith.constant 0 : index
    %69 = vector.load %arg18[%c0_34, %c0_35, %c0_36] : memref<2x2x32xf32, #tpu.memory_space<vmem>>, vector<1x2x32xf32>
    %70 = vector.shape_cast %69 : vector<1x2x32xf32> to vector<2x32xf32>
    %71 = vector.shape_cast %68 : vector<2x32xf32> to vector<1x2x32xf32>
    tpu.vector_store %arg18[%c0_34, %c0_35, %c0_36], %71 {strides = array<i32>} : memref<2x2x32xf32, #tpu.memory_space<vmem>>, vector<1x2x32xf32>,
    %c0_37 = arith.constant 0 : index
    %c0_38 = arith.constant 0 : index
    %c0_39 = arith.constant 0 : index
    %72 = vector.load %arg19[%c0_37, %c0_38, %c0_39] : memref<2x2x32xf32, #tpu.memory_space<vmem>>, vector<1x2x32xf32>
    %73 = vector.shape_cast %72 : vector<1x2x32xf32> to vector<2x32xf32>
    %74 = vector.shape_cast %66 : vector<2x32xf32> to vector<1x2x32xf32>
    tpu.vector_store %arg19[%c0_37, %c0_38, %c0_39], %74 {strides = array<i32>} : memref<2x2x32xf32, #tpu.memory_space<vmem>>, vector<1x2x32xf32>,
    %c1_40 = arith.constant 1 : index
    %c0_41 = arith.constant 0 : index
    %c0_42 = arith.constant 0 : index
    %75 = vector.load %arg18[%c1_40, %c0_41, %c0_42] : memref<2x2x32xf32, #tpu.memory_space<vmem>>, vector<1x2x32xf32>
    %76 = vector.shape_cast %75 : vector<1x2x32xf32> to vector<2x32xf32>
    %c1_43 = arith.constant 1 : index
    %c0_44 = arith.constant 0 : index
    %c0_45 = arith.constant 0 : index
    %77 = vector.load %arg19[%c1_43, %c0_44, %c0_45] : memref<2x2x32xf32, #tpu.memory_space<vmem>>, vector<1x2x32xf32>
    %78 = vector.shape_cast %77 : vector<1x2x32xf32> to vector<2x32xf32>
    %c0_46 = arith.constant 0 : index
    %c0_47 = arith.constant 0 : index
    %79 = vector.load %arg9[%c0_46, %c0_47] : memref<32x128xbf16, #tpu.memory_space<vmem>>, vector<32x128xbf16>
    %80 = arith.extf %79 : vector<32x128xbf16> to vector<32x128xf32>
    %c0_48 = arith.constant 0 : index
    %c0_49 = arith.constant 0 : index
    %81 = vector.load %arg10[%c0_48, %c0_49] : memref<32x128xbf16, #tpu.memory_space<vmem>>, vector<32x128xbf16>
    %82 = arith.extf %81 : vector<32x128xbf16> to vector<32x128xf32>
    %c0_50 = arith.constant 0 : index
    %c0_51 = arith.constant 0 : index
    %83 = vector.load %arg11[%c0_50, %c0_51] : memref<1x128xf32, #tpu.memory_space<vmem>>, vector<1x128xf32>
    %cst_52 = arith.constant dense<0.000000e+00> : vector<2x128xf32>
    %84 = tpu.matmul %68, %80, %cst_52 {dimension_numbers = #tpu.dot_dimension_numbers<[1], [0], [0], [1], [0, 0, 1, 1], [], []>} : vector<2x32xf32>, vector<32x128xf32>, vector<2x128xf32> -> vector<2x128xf32>
    %cst_53 = arith.constant dense<0.000000e+00> : vector<2x128xf32>
    %85 = tpu.matmul %76, %82, %cst_53 {dimension_numbers = #tpu.dot_dimension_numbers<[1], [0], [0], [1], [0, 0, 1, 1], [], []>} : vector<2x32xf32>, vector<32x128xf32>, vector<2x128xf32> -> vector<2x128xf32>
    %86 = arith.addf %84, %85 : vector<2x128xf32>
    %87 = vector.broadcast %83 : vector<1x128xf32> to vector<2x128xf32>
    %88 = arith.addf %86, %87 : vector<2x128xf32>
    %89 = vector.extract_strided_slice %88 {offsets = [0, 0], sizes = [2, 32], strides = [1, 1]} : vector<2x128xf32> to vector<2x32xf32>
    %90 = arith.negf %89 : vector<2x32xf32>
    %91 = math.exp %90 : vector<2x32xf32>
    %cst_54 = arith.constant 1.000000e+00 : f32
    %92 = vector.broadcast %cst_54 : f32 to vector<2x32xf32>
    %93 = arith.addf %92, %91 : vector<2x32xf32>
    %94 = arith.divf %92, %93 : vector<2x32xf32>
    %95 = vector.extract_strided_slice %88 {offsets = [0, 32], sizes = [2, 32], strides = [1, 1]} : vector<2x128xf32> to vector<2x32xf32>
    %96 = arith.negf %95 : vector<2x32xf32>
    %97 = math.exp %96 : vector<2x32xf32>
    %cst_55 = arith.constant 1.000000e+00 : f32
    %98 = vector.broadcast %cst_55 : f32 to vector<2x32xf32>
    %99 = arith.addf %98, %97 : vector<2x32xf32>
    %100 = arith.divf %98, %99 : vector<2x32xf32>
    %101 = vector.extract_strided_slice %88 {offsets = [0, 64], sizes = [2, 32], strides = [1, 1]} : vector<2x128xf32> to vector<2x32xf32>
    %102 = math.tanh %101 : vector<2x32xf32>
    %103 = vector.extract_strided_slice %88 {offsets = [0, 96], sizes = [2, 32], strides = [1, 1]} : vector<2x128xf32> to vector<2x32xf32>
    %104 = arith.negf %103 : vector<2x32xf32>
    %105 = math.exp %104 : vector<2x32xf32>
    %cst_56 = arith.constant 1.000000e+00 : f32
    %106 = vector.broadcast %cst_56 : f32 to vector<2x32xf32>
    %107 = arith.addf %106, %105 : vector<2x32xf32>
    %108 = arith.divf %106, %107 : vector<2x32xf32>
    %109 = arith.mulf %100, %78 : vector<2x32xf32>
    %110 = arith.mulf %94, %102 : vector<2x32xf32>
    %111 = arith.addf %109, %110 : vector<2x32xf32>
    %112 = math.tanh %111 : vector<2x32xf32>
    %113 = arith.mulf %108, %112 : vector<2x32xf32>
    %c1_57 = arith.constant 1 : index
    %c0_58 = arith.constant 0 : index
    %c0_59 = arith.constant 0 : index
    %114 = vector.load %arg18[%c1_57, %c0_58, %c0_59] : memref<2x2x32xf32, #tpu.memory_space<vmem>>, vector<1x2x32xf32>
    %115 = vector.shape_cast %114 : vector<1x2x32xf32> to vector<2x32xf32>
    %116 = vector.shape_cast %113 : vector<2x32xf32> to vector<1x2x32xf32>
    tpu.vector_store %arg18[%c1_57, %c0_58, %c0_59], %116 {strides = array<i32>} : memref<2x2x32xf32, #tpu.memory_space<vmem>>, vector<1x2x32xf32>,
    %c1_60 = arith.constant 1 : index
    %c0_61 = arith.constant 0 : index
    %c0_62 = arith.constant 0 : index
    %117 = vector.load %arg19[%c1_60, %c0_61, %c0_62] : memref<2x2x32xf32, #tpu.memory_space<vmem>>, vector<1x2x32xf32>
    %118 = vector.shape_cast %117 : vector<1x2x32xf32> to vector<2x32xf32>
    %119 = vector.shape_cast %111 : vector<2x32xf32> to vector<1x2x32xf32>
    tpu.vector_store %arg19[%c1_60, %c0_61, %c0_62], %119 {strides = array<i32>} : memref<2x2x32xf32, #tpu.memory_space<vmem>>, vector<1x2x32xf32>,
    %c0_63 = arith.constant 0 : index
    %c0_64 = arith.constant 0 : index
    %120 = vector.load %arg12[%c0_63, %c0_64] : memref<32x16xbf16, #tpu.memory_space<vmem>>, vector<32x16xbf16>
    %121 = arith.extf %120 : vector<32x16xbf16> to vector<32x16xf32>
    %cst_65 = arith.constant dense<0.000000e+00> : vector<2x16xf32>
    %122 = tpu.matmul %113, %121, %cst_65 {dimension_numbers = #tpu.dot_dimension_numbers<[1], [0], [0], [1], [0, 0, 1, 1], [], []>} : vector<2x32xf32>, vector<32x16xf32>, vector<2x16xf32> -> vector<2x16xf32>
    %c0_66 = arith.constant 0 : index
    %c0_67 = arith.constant 0 : index
    %123 = vector.load %arg13[%c0_66, %c0_67] : memref<1x16xf32, #tpu.memory_space<vmem>>, vector<1x16xf32>
    %124 = vector.broadcast %123 : vector<1x16xf32> to vector<2x16xf32>
    %125 = arith.addf %122, %124 : vector<2x16xf32>
    %c0_68 = arith.constant 0 : index
    %c0_69 = arith.constant 0 : index
    %c0_70 = arith.constant 0 : index
    %126 = vector.load %arg14[%c0_68, %c0_69, %c0_70] : memref<1x2x16xf32, #tpu.memory_space<vmem>>, vector<1x2x16xf32>
    %127 = vector.shape_cast %126 : vector<1x2x16xf32> to vector<2x16xf32>
    %128 = vector.shape_cast %125 : vector<2x16xf32> to vector<1x2x16xf32>
    tpu.vector_store %arg14[%c0_68, %c0_69, %c0_70], %128 {strides = array<i32>} : memref<1x2x16xf32, #tpu.memory_space<vmem>>, vector<1x2x16xf32>,
    %c0_i32_71 = arith.constant 0 : i32
    %129 = arith.cmpi eq, %arg0, %c0_i32_71 : i32
    %130 = arith.extui %129 : i1 to i32
    %c0_i32_72 = arith.constant 0 : i32
    %131 = arith.cmpi ne, %130, %c0_i32_72 : i32
    scf.if %131 {
      %c0_73 = arith.constant 0 : index
      %c0_74 = arith.constant 0 : index
      %c0_75 = arith.constant 0 : index
      %132 = vector.load %arg18[%c0_73, %c0_74, %c0_75] : memref<2x2x32xf32, #tpu.memory_space<vmem>>, vector<2x2x32xf32>
      %c0_76 = arith.constant 0 : index
      %c0_77 = arith.constant 0 : index
      %c0_78 = arith.constant 0 : index
      %133 = vector.load %arg15[%c0_76, %c0_77, %c0_78] : memref<2x2x32xf32, #tpu.memory_space<vmem>>, vector<2x2x32xf32>
      tpu.vector_store %arg15[%c0_76, %c0_77, %c0_78], %132 {strides = array<i32>} : memref<2x2x32xf32, #tpu.memory_space<vmem>>, vector<2x2x32xf32>,
      %c0_79 = arith.constant 0 : index
      %c0_80 = arith.constant 0 : index
      %c0_81 = arith.constant 0 : index
      %134 = vector.load %arg19[%c0_79, %c0_80, %c0_81] : memref<2x2x32xf32, #tpu.memory_space<vmem>>, vector<2x2x32xf32>
      %c0_82 = arith.constant 0 : index
      %c0_83 = arith.constant 0 : index
      %c0_84 = arith.constant 0 : index
      %135 = vector.load %arg16[%c0_82, %c0_83, %c0_84] : memref<2x2x32xf32, #tpu.memory_space<vmem>>, vector<2x2x32xf32>
      tpu.vector_store %arg16[%c0_82, %c0_83, %c0_84], %134 {strides = array<i32>} : memref<2x2x32xf32, #tpu.memory_space<vmem>>, vector<2x2x32xf32>,
    } else {
    }
    return
  }
  func.func @transform_0(%arg0: i32) -> (i32, i32, i32) {
    %c0_i32 = arith.constant 0 : i32
    %c0_i32_0 = arith.constant 0 : i32
    %c0_i32_1 = arith.constant 0 : i32
    return %arg0, %c0_i32, %c0_i32_0 : i32, i32, i32
  }
  func.func @transform_1(%arg0: i32) -> (i32, i32, i32) {
    %c0_i32 = arith.constant 0 : i32
    %c0_i32_0 = arith.constant 0 : i32
    %c0_i32_1 = arith.constant 0 : i32
    %c0_i32_2 = arith.constant 0 : i32
    return %c0_i32, %c0_i32_0, %c0_i32_1 : i32, i32, i32
  }
  func.func @transform_2(%arg0: i32) -> (i32, i32, i32) {
    %c0_i32 = arith.constant 0 : i32
    %c0_i32_0 = arith.constant 0 : i32
    %c0_i32_1 = arith.constant 0 : i32
    %c0_i32_2 = arith.constant 0 : i32
    return %c0_i32, %c0_i32_0, %c0_i32_1 : i32, i32, i32
  }
  func.func @transform_3(%arg0: i32) -> (i32, i32, i32) {
    %c0_i32 = arith.constant 0 : i32
    %c0_i32_0 = arith.constant 0 : i32
    %c0_i32_1 = arith.constant 0 : i32
    %c0_i32_2 = arith.constant 0 : i32
    return %c0_i32, %c0_i32_0, %c0_i32_1 : i32, i32, i32
  }
  func.func @transform_4(%arg0: i32) -> (i32, i32) {
    %c0_i32 = arith.constant 0 : i32
    %c0_i32_0 = arith.constant 0 : i32
    %c0_i32_1 = arith.constant 0 : i32
    return %c0_i32, %c0_i32_0 : i32, i32
  }
  func.func @transform_5(%arg0: i32) -> (i32, i32) {
    %c0_i32 = arith.constant 0 : i32
    %c0_i32_0 = arith.constant 0 : i32
    %c0_i32_1 = arith.constant 0 : i32
    return %c0_i32, %c0_i32_0 : i32, i32
  }
  func.func @transform_6(%arg0: i32) -> (i32, i32) {
    %c0_i32 = arith.constant 0 : i32
    %c0_i32_0 = arith.constant 0 : i32
    %c0_i32_1 = arith.constant 0 : i32
    return %c0_i32, %c0_i32_0 : i32, i32
  }
  func.func @transform_7(%arg0: i32) -> (i32, i32) {
    %c0_i32 = arith.constant 0 : i32
    %c0_i32_0 = arith.constant 0 : i32
    %c0_i32_1 = arith.constant 0 : i32
    return %c0_i32, %c0_i32_0 : i32, i32
  }
  func.func @transform_8(%arg0: i32) -> (i32, i32) {
    %c0_i32 = arith.constant 0 : i32
    %c0_i32_0 = arith.constant 0 : i32
    %c0_i32_1 = arith.constant 0 : i32
    return %c0_i32, %c0_i32_0 : i32, i32
  }
  func.func @transform_9(%arg0: i32) -> (i32, i32) {
    %c0_i32 = arith.constant 0 : i32
    %c0_i32_0 = arith.constant 0 : i32
    %c0_i32_1 = arith.constant 0 : i32
    return %c0_i32, %c0_i32_0 : i32, i32
  }
  func.func @transform_10(%arg0: i32) -> (i32, i32) {
    %c0_i32 = arith.constant 0 : i32
    %c0_i32_0 = arith.constant 0 : i32
    %c0_i32_1 = arith.constant 0 : i32
    return %c0_i32, %c0_i32_0 : i32, i32
  }
  func.func @transform_11(%arg0: i32) -> (i32, i32) {
    %c0_i32 = arith.constant 0 : i32
    %c0_i32_0 = arith.constant 0 : i32
    %c0_i32_1 = arith.constant 0 : i32
    return %c0_i32, %c0_i32_0 : i32, i32
  }
  func.func @transform_12(%arg0: i32) -> (i32, i32) {
    %c0_i32 = arith.constant 0 : i32
    %c0_i32_0 = arith.constant 0 : i32
    %c0_i32_1 = arith.constant 0 : i32
    return %c0_i32, %c0_i32_0 : i32, i32
  }
  func.func @transform_13(%arg0: i32) -> (i32, i32, i32) {
    %c0_i32 = arith.constant 0 : i32
    %c0_i32_0 = arith.constant 0 : i32
    %c0_i32_1 = arith.constant 0 : i32
    return %arg0, %c0_i32, %c0_i32_0 : i32, i32, i32
  }
  func.func @transform_14(%arg0: i32) -> (i32, i32, i32) {
    %c0_i32 = arith.constant 0 : i32
    %c0_i32_0 = arith.constant 0 : i32
    %c0_i32_1 = arith.constant 0 : i32
    %c0_i32_2 = arith.constant 0 : i32
    return %c0_i32, %c0_i32_0, %c0_i32_1 : i32, i32, i32
  }
  func.func @transform_15(%arg0: i32) -> (i32, i32, i32) {
    %c0_i32 = arith.constant 0 : i32
    %c0_i32_0 = arith.constant 0 : i32
    %c0_i32_1 = arith.constant 0 : i32
    %c0_i32_2 = arith.constant 0 : i32
    return %c0_i32, %c0_i32_0, %c0_i32_1 : i32, i32, i32
  }
  func.func @transform_16(%arg0: i32) -> (i32, i32, i32) {
    %c0_i32 = arith.constant 0 : i32
    %c0_i32_0 = arith.constant 0 : i32
    %c0_i32_1 = arith.constant 0 : i32
    return %arg0, %c0_i32, %c0_i32_0 : i32, i32, i32
  }
}

</mosaic_0001>

<bundles_post_ra>
// kernel: decoder_decode.1
= control target key start
LH: loop header
LB: loop body
LE: loop exit
PB: predicated region body
PF: predicated region fallthrough
CT: control target
= control target key end

     0   :  { %s1967_s0 = inlined_call_operand.vmem [shape: f32[1,2,32], index: 0, kind: input, shape index: {}]   ;;  %s1968_s1 = inlined_call_operand.hbm [shape: f32[2,2,32], index: 1, kind: input, shape index: {}, may-alias: {1,14}]   ;;  %s1969_s2 = inlined_call_operand.hbm [shape: f32[2,2,32], index: 2, kind: input, shape index: {}, may-alias: {2,15}]   ;;  %s1970_s3 = inlined_call_operand.vmem [shape: f32[2,8,32], index: 3, kind: input, shape index: {}]   ;;  %s1971_s4 = inlined_call_operand.vmem [shape: bf16[32,128], index: 4, kind: input, shape index: {}]   ;;  %s1972_s5 = inlined_call_operand.vmem [shape: bf16[32,128], index: 5, kind: input, shape index: {}]   ;;  %s1973_s6 = inlined_call_operand.hbm [shape: bf16[32,128], index: 6, kind: input, shape index: {}]   ;;  %s1974_s7 = inlined_call_operand.hbm [shape: f32[1,128], index: 7, kind: input, shape index: {}]   ;;  %s1975_s8 = inlined_call_operand.hbm [shape: bf16[32,128], index: 8, kind: input, shape index: {}]   ;;  %s1976_s9 = inlined_call_operand.hbm [shape: bf16[32,128], index: 9, kind: input, shape index: {}]   ;;  %s1977_s10 = inlined_call_operand.hbm [shape: f32[1,128], index: 10, kind: input, shape index: {}]   ;;  %s1978_s11 = inlined_call_operand.vmem [shape: bf16[32,16], index: 11, kind: input, shape index: {}]   ;;  %s1979_s12 = inlined_call_operand.hbm [shape: f32[1,16], index: 12, kind: input, shape index: {}]   ;;  %s1980_s13 = inlined_call_operand.hbm [shape: f32[1,2,16], index: 13, kind: output, shape index: {0}]   ;;  %s1981_s14 = inlined_call_operand.hbm [shape: f32[2,2,32], index: 14, kind: output, shape index: {1}, may-alias: {1,14}]   ;;  %s1982_s15 = inlined_call_operand.hbm [shape: f32[2,2,32], index: 15, kind: output, shape index: {2}, may-alias: {2,15}]   ;;  %s1983_s16 = inlined_call_operand.hbm [shape: f32[1,2,8], index: 16, kind: output, shape index: {3}]  }
   0x1   :  { %1984 = sst [smem:[#allocation32_spill]] %s1967_s0 }
   0x2   :  { %22 = vsyncpa [#allocation5], 0 }
   0x3   :  { %23 = vsyncpa [#allocation8], 0 }
   0x4   :  { %24 = vsyncpa [#allocation11], 0 }
   0x5   :  { %25 = vsyncpa [#allocation14], 0 }
   0x6   :  { %26 = vsyncpa [#allocation17], 0 }
   0x7   :  { %27 = vsyncpa [#allocation6], 0 }
   0x8   :  { %28 = vsyncpa [#allocation20], 0 }
   0x9   :  { %29 = vsyncpa [#allocation23], 0  ;;  %s1688_s21 = smov [#allocation7]   ;;  %s1689_s23 = smov [#allocation10]  }
   0xa   :  { %s49_s22 = sshll.u32 %s1688_s21, 4  ;;  %s80_s24 = sshll.u32 %s1689_s23, 4  ;;  %s50_s22 = int_to_ptr.vmem [resolvable:$true] %s49_s22  ;;  %s81_s24 = int_to_ptr.vmem [resolvable:$true] %s80_s24 }
   0xb   :  { %s1440_s25 = scalar_lea.vmem %s50_s22, 64  ;;  %p1445_p1 = scmp.lt.s32.totalorder %s50_s22, %s50_s22 }
   0xc   :  { %p1441_p0 = scmp.ne.s32.totalorder %s50_s22, %s1440_s25  ;;  %p1446_p2 = scmp.lt.s32.totalorder %s1440_s25, %s1440_s25 }
   0xe   :  { %p1447_p3 = por %p1446_p2, %p1445_p1 }
  0x10   :  { %p1448_p4 = pnand %p1447_p3, %p1441_p0 }
  0x12   :  { %1451 = shalt.err (!%p1448_p4)
}
  0x13   :  { %s1690_s26 = smov 32   ;;  %s1691_s27 = smov 2  }
  0x14   :  { %55 = dma.hbm_to_vmem [thread:$0]  %s1969_s2, 64, %s50_s22, [#allocation8], %s1690_s26, %s1690_s26, %s1691_s27  }
  0x15   :  { %s1460_s30 = scalar_lea.vmem %s81_s24, 16  ;;  %s1464_s0 = scalar_lea.vmem %s81_s24, 32 }
  0x16   :  { %p1461_p5 = scmp.ne.s32.totalorder %s81_s24, %s1460_s30  ;;  %p1465_p6 = scmp.lt.s32.totalorder %s81_s24, %s81_s24 }
  0x17   :  { %p1466_p7 = scmp.lt.s32.totalorder %s1464_s0, %s1460_s30 }
  0x19   :  { %p1467_p8 = por %p1466_p7, %p1465_p6 }
  0x1b   :  { %p1468_p9 = pnand %p1467_p8, %p1461_p5 }
  0x1d   :  { %1471 = shalt.err (!%p1468_p9)
}
  0x1e   :  { %83 = dma.hbm_to_vmem [thread:$0]  %s1974_s7, 16, %s81_s24, [#allocation11]  }
  0x1f   :  { %s1692_s19 = smov [#allocation13]   ;;  %s1693_s21 = smov [#allocation4]  }
  0x20   :  { %s101_s20 = sshll.u32 %s1692_s19, 4  ;;  %s37_s23 = sshll.u32 %s1693_s21, 4  ;;  %s102_s20 = int_to_ptr.vmem [resolvable:$true] %s101_s20  ;;  %s38_s23 = int_to_ptr.vmem [resolvable:$true] %s37_s23 }
  0x21   :  { %s1480_s25 = scalar_lea.vmem %s102_s20, 256  ;;  %p1485_p11 = scmp.lt.s32.totalorder %s102_s20, %s102_s20 }
  0x22   :  { %p1481_p10 = scmp.ne.s32.totalorder %s102_s20, %s1480_s25  ;;  %p1486_p12 = scmp.lt.s32.totalorder %s1480_s25, %s1480_s25 }
  0x24   :  { %p1487_p13 = por %p1486_p12, %p1485_p11 }
  0x26   :  { %p1488_p0 = pnand %p1487_p13, %p1481_p10 }
  0x28   :  { %1491 = shalt.err (!%p1488_p0)
}
  0x29   :  { %s1694_s2 = smov 64   ;;  %s1695_s22 = smov 4  }
  0x2a   :  { %107 = dma.hbm_to_vmem [thread:$0]  %s1976_s9, 256, %s102_s20, [#allocation14], %s1694_s2, %s1694_s2, %s1695_s22  }
  0x2b   :  { %s1500_s24 = scalar_lea.vmem %s38_s23, 64  ;;  %p1505_p2 = scmp.lt.s32.totalorder %s38_s23, %s38_s23 }
  0x2c   :  { %p1501_p1 = scmp.ne.s32.totalorder %s38_s23, %s1500_s24  ;;  %p1506_p3 = scmp.lt.s32.totalorder %s1500_s24, %s1500_s24 }
  0x2e   :  { %p1507_p4 = por %p1506_p3, %p1505_p2 }
  0x30   :  { %p1508_p5 = pnand %p1507_p4, %p1501_p1 }
  0x32   :  { %1511 = shalt.err (!%p1508_p5)
}
  0x33   :  { %43 = dma.hbm_to_vmem [thread:$0]  %s1968_s1, 64, %s38_s23, [#allocation5], %s1690_s26, %s1690_s26, %s1691_s27  }
  0x34   :  { %s1696_s0 = smov [#allocation9]   ;;  %s1697_s18 = smov [#allocation12]  }
  0x35   :  { %s67_s17 = sshll.u32 %s1696_s0, 4  ;;  %s89_s19 = sshll.u32 %s1697_s18, 4  ;;  %s68_s17 = int_to_ptr.vmem [resolvable:$true] %s67_s17  ;;  %s90_s19 = int_to_ptr.vmem [resolvable:$true] %s89_s19 }
  0x36   :  { %s1520_s9 = scalar_lea.vmem %s68_s17, 256  ;;  %p1525_p7 = scmp.lt.s32.totalorder %s68_s17, %s68_s17 }
  0x37   :  { %p1521_p6 = scmp.ne.s32.totalorder %s68_s17, %s1520_s9  ;;  %p1526_p8 = scmp.lt.s32.totalorder %s1520_s9, %s1520_s9 }
  0x39   :  { %p1527_p9 = por %p1526_p8, %p1525_p7 }
  0x3b   :  { %p1528_p10 = pnand %p1527_p9, %p1521_p6 }
  0x3d   :  { %1531 = shalt.err (!%p1528_p10)
}
  0x3e   :  { %73 = dma.hbm_to_vmem [thread:$0]  %s1973_s6, 256, %s68_s17, [#allocation8], %s1694_s2, %s1694_s2, %s1695_s22  }
  0x3f   :  { %s1540_s1 = scalar_lea.vmem %s90_s19, 256  ;;  %p1545_p12 = scmp.lt.s32.totalorder %s90_s19, %s90_s19 }
  0x40   :  { %p1541_p11 = scmp.ne.s32.totalorder %s90_s19, %s1540_s1  ;;  %p1546_p13 = scmp.lt.s32.totalorder %s1540_s1, %s1540_s1 }
  0x42   :  { %p1547_p0 = por %p1546_p13, %p1545_p12 }
  0x44   :  { %p1548_p1 = pnand %p1547_p0, %p1541_p11 }
  0x46   :  { %1551 = shalt.err (!%p1548_p1)
}
  0x47   :  { %95 = dma.hbm_to_vmem [thread:$0]  %s1975_s8, 256, %s90_s19, [#allocation11], %s1694_s2, %s1694_s2, %s1695_s22  }
  0x48   :  { %s1698_s28 = smov [#allocation15]   ;;  %s1699_s24 = smov [#allocation16]  }
  0x49   :  { %s114_s7 = sshll.u32 %s1698_s28, 4  ;;  %s126_s29 = sshll.u32 %s1699_s24, 4  ;;  %s115_s7 = int_to_ptr.vmem [resolvable:$true] %s114_s7  ;;  %s127_s29 = int_to_ptr.vmem [resolvable:$true] %s126_s29 }
  0x4a   :  { %s1560_s6 = scalar_lea.vmem %s115_s7, 16  ;;  %s1564_s30 = scalar_lea.vmem %s115_s7, 32 }
  0x4b   :  { %p1561_p2 = scmp.ne.s32.totalorder %s115_s7, %s1560_s6  ;;  %p1565_p3 = scmp.lt.s32.totalorder %s115_s7, %s115_s7 }
  0x4c   :  { %p1566_p4 = scmp.lt.s32.totalorder %s1564_s30, %s1560_s6 }
  0x4e   :  { %p1567_p5 = por %p1566_p4, %p1565_p3 }
  0x50   :  { %p1568_p6 = pnand %p1567_p5, %p1561_p2 }
  0x52   :  { %1571 = shalt.err (!%p1568_p6)
}
  0x53   :  { %117 = dma.hbm_to_vmem [thread:$0]  %s1977_s10, 16, %s115_s7, [#allocation14]  }
  0x54   :  { %s1580_s18 = scalar_lea.vmem %s127_s29, 16  ;;  %s1584_s8 = scalar_lea.vmem %s127_s29, 32 }
  0x55   :  { %p1581_p7 = scmp.ne.s32.totalorder %s127_s29, %s1580_s18  ;;  %p1585_p8 = scmp.lt.s32.totalorder %s127_s29, %s127_s29 }
  0x56   :  { %p1586_p9 = scmp.lt.s32.totalorder %s1584_s8, %s1580_s18 }
  0x58   :  { %p1587_p10 = por %p1586_p9, %p1585_p8 }
  0x5a   :  { %p1588_p11 = pnand %p1587_p10, %p1581_p7 }
  0x5c   :  { %1591 = shalt.err (!%p1588_p11)
}
  0x5d   :  { %129 = dma.hbm_to_vmem [thread:$0]  %s1979_s12, 16, %s127_s29, [#allocation17]  }
  0x5e   :  { %1672 = dma.done.wait [#allocation5], 64  }
  0x5f   :  { %1673 = vsyncadd [#allocation5], 4294967232 }
  0x60   :  { %1674 = dma.done.wait [#allocation8], 320  }
  0x61   :  { %1675 = vsyncadd [#allocation8], 4294966976 }
  0x62   :  { %1676 = dma.done.wait [#allocation11], 272  }
  0x63   :  { %1677 = vsyncadd [#allocation11], 4294967024 }
  0x64   :  { %1678 = dma.done.wait [#allocation14], 272  }
  0x65   :  { %1679 = vsyncadd [#allocation14], 4294967024 }
  0x66   :  { %1680 = dma.done.wait [#allocation17], 16  }
  0x67   :  { %1681 = vsyncadd [#allocation17], 4294967280  ;;  %v1700_v0 = vmov 0.0   ;;  %vm1701_vm0 = vmmov 0   ;;  %vm194_vm1 = vcmask 261120   ;;  %vm160_vm2 = vcmask 254976  }
  0x68   :  { %1307 = vmatprep.subr.mxu1 %v1700_v0  ;;  %1302 = vmatprep.subr.mxu0 %v1700_v0  ;;  %v1702_v1 = vmov 1966171168   ;;  %v183_v3 = vlaneseq  ;;  %v168_v4 = vld [vmem:[%s1970_s3 + $0x8] sm:$0xff]  ;;  %v167_v5 = vld [vmem:[%s1970_s3] sm:$0xff]  ;;  %vm345_vm3 = vcmask 57344   ;;  %vm376_vm4 = vcmask 64512  }
  0x69   :  { %1309 = vmatprep.mubr.msk.f32.mxu1 %vm1701_vm0, %v1700_v0  ;;  %1304 = vmatprep.mubr.msk.f32.mxu0 %vm1701_vm0, %v1700_v0  ;;  %v181_v2 = vunpack.c.l.s4 %v1702_v1  ;;  %v159_v6 = vld [vmem:[#allocation4 + $0x2] sm:$0x3]  ;;  %vm371_vm5 = vcmask 1041409   ;;  %vm374_vm6 = vcmask 58368   ;;  %v1219_v44 = vld [vmem:[%s1972_s5] sm:$0xff]   ;;  %s1985_s29 = sld [smem:[#allocation32_spill]] }
  0x6a   :  { %1308 = vmatpush3.xpose.msk.msra.mxu1 %vm194_vm1, %v168_v4  ;;  %1303 = vmatpush3.xpose.msk.msra.mxu0 %vm194_vm1, %v167_v5  ;;  %162 = vst.msk [vmem:[#allocation2 + $0x2] sm:$0x3] %vm160_vm2, %v159_v6  ;;  %v184_v8 = vshrl.u32 %v183_v3, 7  ;;  %v1258_v32 = vld [vmem:[%s1971_s4 + $0x8] sm:$0xff]   ;;  %v1221_v45 = vunpack.c.h.bf16 %v1219_v44  ;;  %v1211_v46 = vld [vmem:[%s1971_s4] sm:$0xff]   ;;  %v1220_v48 = vunpack.c.l.bf16 %v1219_v44  ;;  %v1260_v55 = vld [vmem:[#allocation9 + $0x8] sm:$0xff]  }
  0x6b   :  { %1317 = vmatprep.subr.mxu1 %v1700_v0  ;;  %1312 = vmatprep.subr.mxu0 %v1700_v0  ;;  %v182_v7 = vunpack.c.0.s8 %v181_v2  ;;  %v1217_v34 = vunpack.c.h.bf16 %v1258_v32  ;;  %v1259_v36 = vld [vmem:[%s1972_s5 + $0x8] sm:$0xff]   ;;  %v1216_v43 = vunpack.c.l.bf16 %v1258_v32  ;;  %v1213_v47 = vunpack.c.h.bf16 %v1211_v46  ;;  %v1227_v60 = vld [vmem:[#allocation9] sm:$0xff]   ;;  %s1703_s18 = smov 96  }
  0x6c   :  { %v1225_v38 = vunpack.c.h.bf16 %v1259_v36  ;;  %v1224_v42 = vunpack.c.l.bf16 %v1259_v36  ;;  %v1212_v49 = vunpack.c.l.bf16 %v1211_v46  ;;  %v158_v51 = vld [vmem:[#allocation4] sm:$0x3]  ;;  %v163_v52 = vld [vmem:[#allocation7] sm:$0x3]  ;;  %v1233_v58 = vunpack.c.h.bf16 %v1260_v55 }
  0x6d   :  { %v185_v9 = vsub.s32 %v182_v7, %v184_v8  ;;  %161 = vst.msk [vmem:[#allocation2] sm:$0x3] %vm160_vm2, %v158_v51  ;;  %165 = vst.msk [vmem:[#allocation3] sm:$0x3] %vm160_vm2, %v163_v52  ;;  %v1232_v62 = vunpack.c.l.bf16 %v1260_v55  ;;  %v1229_v1 = vunpack.c.h.bf16 %v1227_v60  ;;  %v1228_v2 = vunpack.c.l.bf16 %v1227_v60 }
  0x6f   :  { %v521_v50 = vld [vmem:[%s1985_s29] sm:$0x3] }
  0x71   :  { %v1192_v10 = vld.sshfl [vmem:[#allocation2 + $0x2] sm:$0x11 pattern:$0x75316420] }
  0x72   :  { %v179_v11 = vcombine.high %v1192_v10, %v1192_v10  ;;  %v186_v12 = vrot.slane %v1192_v10, %v185_v9 }
  0x74   :  { %v193_v13 = vrot.slane %v179_v11, %v185_v9  ;;  %1305 = vmatmul.mubr.msk.f32.vlgmr.msra.gmra.mxu0 %vm194_vm1, %v186_v12  ;;  %v523_v53 = vld [vmem:[#allocation3] sm:$0x3]  ;;  %v522_v3 = vld [vmem:[#allocation2] sm:$0x3] }
  0x75   :  { %1313 = vmatpush3.msra.mxu0 %v167_v5  ;;  %1314 = vmatprep.mubr.msk.f32.mxu0 %vm1701_vm0, %v1700_v0  ;;  %v1202_v9 = vld [vmem:[#allocation10] ss:$0 sm:$0xff] }
  0x76   :  { %1310 = vmatmul.mubr.msk.f32.vlgmr.msra.gmra.mxu1 %vm194_vm1, %v193_v13  ;;  %1322 = vmatprep.subr.mxu0 %v1700_v0 }
  0x77   :  { %1318 = vmatpush3.msra.mxu1 %v168_v4  ;;  %1319 = vmatprep.mubr.msk.f32.mxu1 %vm1701_vm0, %v1700_v0 }
  0x78   :  { %1333 = vmatprep.subr.mxu1 %v1700_v0 }
 0x134   :  { %v266_v14 = vpop.f32.mrf.mxu0 }
 0x135   :  { %v346_v19 = vsel %vm345_vm3, %v266_v14, -inf }
 0x136   :  { %v341_v15 = vpop.f32.mrf.mxu1  ;;  %v1306_v16 = vpop.f32.mrf.mxu0 }
 0x137   :  { %v349_v17 = vsel %vm345_vm3, %v341_v15, -inf }
 0x138   :  { %350 = vmax.xlane.f32.xlu0 %v349_v17  ;;  %v1311_v18 = vpop.f32.mrf.mxu1 }
 0x13c   :  { %347 = vmax.xlane.f32.xlu0 %v346_v19 }
 0x1c1   :  { %v351_v20 = vpop.xlane.xlu0 %350 }
 0x1c2   :  { %v353_v21 = vsub.f32 %v341_v15, %v351_v20 }
 0x1c4   :  { %v356_v22 = vmul.f32 1.442695, %v353_v21 }
 0x1c5   :  { %v348_v23 = vpop.xlane.xlu0 %347 }
 0x1c6   :  { %1408 = vpow2.f32 %v356_v22  ;;  %v352_v24 = vsub.f32 %v266_v14, %v348_v23 }
 0x1c8   :  { %v354_v25 = vmul.f32 1.442695, %v352_v24 }
 0x1ca   :  { %1410 = vpow2.f32 %v354_v25  ;;  %v1262_v25 = vld [vmem:[#allocation13 + $0x8] sm:$0xff]  }
 0x1d3   :  { %v1409_v26 = vpop.eup %1408 }
 0x1d4   :  { %v361_v27 = vsel %vm345_vm3, %v1409_v26, 0.0 }
 0x1d5   :  { %362 = vadd.xlane.f32.xlu1 %v361_v27  ;;  %v1243_v27 = vld [vmem:[#allocation13] sm:$0xff]  }
 0x1d7   :  { %v1411_v28 = vpop.eup %1410 }
 0x1d8   :  { %v358_v29 = vsel %vm345_vm3, %v1411_v28, 0.0 }
 0x1d9   :  { %359 = vadd.xlane.f32.xlu1 %v358_v29  ;;  %v1248_v29 = vunpack.c.l.bf16 %v1262_v25 }
 0x1ea   :  { %787 = vrot.lane.b32.xlu1 %v523_v53, %s1690_s26 }
 0x25e   :  { %v363_v30 = vpop.xlane.xlu1 %362 }
 0x25f   :  { %1412 = vrcp.f32 %v363_v30 }
 0x262   :  { %v360_v31 = vpop.xlane.xlu1 %359 }
 0x263   :  { %1414 = vrcp.f32 %v360_v31  ;;  %v1235_v31 = vld [vmem:[#allocation12] sm:$0xff]  }
 0x264   :  { %v1236_v36 = vunpack.c.l.bf16 %v1235_v31 }
 0x266   :  { %v788_v21 = vpop.permute.xlu1 %787 }
 0x26c   :  { %v1413_v33 = vpop.eup %1412 }
 0x26d   :  { %v367_v35 = vmul.f32 %v1413_v33, %v1409_v26  ;;  %v1261_v26 = vld [vmem:[#allocation12 + $0x8] sm:$0xff]   ;;  %v1245_v33 = vunpack.c.h.bf16 %v1243_v27 }
 0x26e   :  { %v1241_v30 = vunpack.c.h.bf16 %v1261_v26  ;;  %v1240_v32 = vunpack.c.l.bf16 %v1261_v26 }
 0x26f   :  { %1320 = vmatmul.mubr.msk.f32.vlgmr.msra.gmra.mxu1 %vm376_vm4, %v367_v35  ;;  %v370_v40 = vrot.slane %v367_v35, 7  ;;  %v1244_v35 = vunpack.c.l.bf16 %v1243_v27 }
 0x270   :  { %v1415_v37 = vpop.eup %1414  ;;  %1334 = vmatpush3.msra.mxu1 %v1217_v34  ;;  %1341 = vmatprep.mubr.msk.f32.mxu1 %vm1701_vm0, %v1700_v0  ;;  %v1237_v34 = vunpack.c.h.bf16 %v1235_v31 }
 0x271   :  { %v366_v39 = vmul.f32 %v1415_v37, %v1411_v28  ;;  %1335 = vmatprep.subr.mxu1 %v1700_v0  ;;  %v1249_v28 = vunpack.c.h.bf16 %v1262_v25  ;;  %v818_v37 = vld [vmem:[#allocation2 + $0x2] sm:$0x3] }
 0x272   :  { %1336 = vmatpush3.msra.mxu1 %v1216_v43 }
 0x273   :  { %1315 = vmatmul.mubr.msk.f32.vlgmr.msra.gmra.mxu0 %vm376_vm4, %v366_v39  ;;  %v372_v41 = vsel %vm371_vm5, %v370_v40, %v366_v39  ;;  %1337 = vmatprep.subr.mxu1 %v1700_v0  ;;  %v164_v39 = vld [vmem:[#allocation7 + $0x2] sm:$0x3] }
 0x274   :  { %1323 = vmatpush3.msra.mxu0 %v1225_v38  ;;  %1330 = vmatprep.mubr.msk.f32.mxu0 %vm1701_vm0, %v1700_v0  ;;  %375 = vst.msk [vmem:[#allocation22] sm:$0x3] %vm374_vm6, %v372_v41 }
 0x275   :  { %1324 = vmatprep.subr.mxu0 %v1700_v0  ;;  %1338 = vmatpush3.msra.mxu1 %v1213_v47  ;;  %166 = vst.msk [vmem:[#allocation3 + $0x2] sm:$0x3] %vm160_vm2, %v164_v39  ;;  %v1206_v47 = vld [vmem:[#allocation15] ss:$0 sm:$0xff] }
 0x276   :  { %1325 = vmatpush3.msra.mxu0 %v1224_v42  ;;  %1339 = vmatprep.subr.mxu1 %v1700_v0 }
 0x277   :  { %1326 = vmatprep.subr.mxu0 %v1700_v0  ;;  %1340 = vmatpush3.msra.mxu1 %v1212_v49 }
 0x278   :  { %1327 = vmatpush3.msra.mxu0 %v1221_v45  ;;  %1342 = vmatmul.mubr.msk.f32.vlgmr.msra.gmra.mxu1 %vm194_vm1, %v521_v50 }
 0x279   :  { %1328 = vmatprep.subr.mxu0 %v1700_v0  ;;  %1355 = vmatprep.subr.mxu1 %v1700_v0 }
 0x27a   :  { %1329 = vmatpush3.msra.mxu0 %v1220_v48  ;;  %1363 = vmatprep.mubr.msk.f32.mxu1 %vm1701_vm0, %v1700_v0 }
 0x27b   :  { %1344 = vmatprep.subr.mxu0 %v1700_v0  ;;  %1356 = vmatpush3.msra.mxu1 %v1249_v28 }
 0x27c   :  { %1357 = vmatprep.subr.mxu1 %v1700_v0  ;;  %v820_v42 = vld [vmem:[#allocation3 + $0x2] sm:$0x3] }
 0x27d   :  { %1358 = vmatpush3.msra.mxu1 %v1248_v29 }
 0x27e   :  { %1359 = vmatprep.subr.mxu1 %v1700_v0 }
 0x27f   :  { %1360 = vmatpush3.msra.mxu1 %v1245_v33 }
 0x280   :  { %1361 = vmatprep.subr.mxu1 %v1700_v0 }
 0x281   :  { %1362 = vmatpush3.msra.mxu1 %v1244_v35 }
 0x282   :  { %1364 = vmatmul.mubr.msk.f32.vlgmr.msra.gmra.mxu1 %vm194_vm1, %v818_v37  ;;  %1377 = vmatprep.subr.mxu1 %v1700_v0 }
 0x283   :  { %1385 = vmatprep.mubr.msk.f32.mxu1 %vm1701_vm0, %v1700_v0 }
 0x32f   :  { %v517_v54 = vpop.f32.mrf.mxu1 }
 0x330   :  { %v551_v57 = vrot.slane %v517_v54, 7 }
 0x331   :  { %v1321_v56 = vpop.f32.mrf.mxu1 }
 0x333   :  { %v445_v59 = vpop.f32.mrf.mxu0 }
 0x334   :  { %v552_v61 = vsel %vm371_vm5, %v551_v57, %v445_v59 }
 0x335   :  { %v1316_v63 = vpop.f32.mrf.mxu0  ;;  %1331 = vmatmul.mubr.msk.f32.vlgmr.msra.gmra.mxu0 %vm194_vm1, %v552_v61 }
 0x336   :  { %1345 = vmatpush3.msra.mxu0 %v1233_v58  ;;  %1352 = vmatprep.mubr.msk.f32.mxu0 %vm1701_vm0, %v1700_v0  ;;  %v1263_v63 = vld [vmem:[%s1978_s11 + $0x8] sm:$0xff]  }
 0x337   :  { %1346 = vmatprep.subr.mxu0 %v1700_v0 }
 0x338   :  { %1347 = vmatpush3.msra.mxu0 %v1232_v62  ;;  %v694_v4 = vpop.f32.mrf.mxu1 }
 0x339   :  { %1348 = vmatprep.subr.mxu0 %v1700_v0 }
 0x33a   :  { %1349 = vmatpush3.msra.mxu0 %v1229_v1  ;;  %v1343_v5 = vpop.f32.mrf.mxu1  ;;  %v1251_v1 = vld [vmem:[%s1978_s11] sm:$0xff]   ;;  %s1704_s11 = smov [#allocation19]  }
 0x33b   :  { %1350 = vmatprep.subr.mxu0 %v1700_v0  ;;  %v1252_v5 = vunpack.c.l.bf16 %v1251_v1 }
 0x33c   :  { %1351 = vmatpush3.msra.mxu0 %v1228_v2  ;;  %v1257_v2 = vunpack.c.h.bf16 %v1263_v63 }
 0x33d   :  { %1353 = vmatmul.mubr.msk.f32.vlgmr.msra.gmra.mxu0 %vm194_vm1, %v522_v3  ;;  %1366 = vmatprep.subr.mxu0 %v1700_v0  ;;  %v1256_v3 = vunpack.c.l.bf16 %v1263_v63 }
 0x33e   :  { %1374 = vmatprep.mubr.msk.f32.mxu0 %vm1701_vm0, %v1700_v0  ;;  %1367 = vmatpush3.msra.mxu0 %v1241_v30 }
 0x33f   :  { %1368 = vmatprep.subr.mxu0 %v1700_v0  ;;  %1378 = vmatpush3.msra.mxu1 %v1257_v2 }
 0x340   :  { %1369 = vmatpush3.msra.mxu0 %v1240_v32  ;;  %1379 = vmatprep.subr.mxu1 %v1700_v0 }
 0x341   :  { %1370 = vmatprep.subr.mxu0 %v1700_v0  ;;  %1380 = vmatpush3.msra.mxu1 %v1256_v3 }
 0x342   :  { %1371 = vmatpush3.msra.mxu0 %v1237_v34  ;;  %v907_v43 = vpop.f32.mrf.mxu1  ;;  %1381 = vmatprep.subr.mxu1 %v1700_v0 }
 0x343   :  { %1372 = vmatprep.subr.mxu0 %v1700_v0 }
 0x344   :  { %1373 = vmatpush3.msra.mxu0 %v1236_v36  ;;  %v1365_v44 = vpop.f32.mrf.mxu1 }
 0x3f5   :  { %v621_v6 = vpop.f32.mrf.mxu0 }
 0x3f6   :  { %v695_v8 = vadd.f32 %v694_v4, %v621_v6  ;;  %v1253_v4 = vunpack.c.h.bf16 %v1251_v1 }
 0x3f7   :  { %v1332_v7 = vpop.f32.mrf.mxu0 }
 0x3f8   :  { %1382 = vmatpush3.msra.mxu1 %v1253_v4 }
 0x3f9   :  { %1383 = vmatprep.subr.mxu1 %v1700_v0 }
 0x3fa   :  { %1384 = vmatpush3.msra.mxu1 %v1252_v5 }
 0x3fd   :  { %v767_v10 = vpop.f32.mrf.mxu0 }
 0x3fe   :  { %v771_v11 = vadd.f32 %v767_v10, %v695_v8 }
 0x3ff   :  { %v1354_v12 = vpop.f32.mrf.mxu0 }
 0x400   :  { %v778_v13 = vadd.f32 %v1202_v9, %v771_v11 }
 0x402   :  { %1416 = vtanh.f32 %v778_v13  ;;  %v1203_v15 = vmul.f32 -1.442695, %v778_v13 }
 0x404   :  { %1418 = vpow2.f32 %v1203_v15 }
 0x40f   :  { %v1417_v14 = vpop.eup %1416 }
 0x410   :  { %792 = vrot.lane.b32.xlu0 %v1417_v14, %s1694_s2 }
 0x411   :  { %v1419_v16 = vpop.eup %1418 }
 0x412   :  { %v782_v17 = vadd.f32 1.0, %v1419_v16 }
 0x414   :  { %1420 = vrcp.f32 %v782_v17 }
 0x421   :  { %v1421_v18 = vpop.eup %1420 }
 0x422   :  { %v790_v22 = vmul.f32 %v1421_v18, %v788_v21 }
 0x482   :  { %v793_v19 = vpop.permute.xlu0 %792 }
 0x483   :  { %v795_v20 = vmul.f32 %v1421_v18, %v793_v19 }
 0x485   :  { %797 = vrot.lane.b32.xlu1 %v795_v20, %s1690_s26 }
 0x4f7   :  { %v798_v23 = vpop.permute.xlu1 %797 }
 0x4f8   :  { %v1908_v24 = vadd.f32 %v798_v23, %v790_v22 }
 0x4fa   :  { %1422 = vtanh.f32 %v1908_v24 }
 0x507   :  { %v1423_v38 = vpop.eup %1422 }
 0x508   :  { %803 = vrot.lane.b32.xlu1 %v1423_v38, %s1694_s2 }
 0x57a   :  { %v804_v40 = vpop.permute.xlu1 %803 }
 0x57b   :  { %v806_v41 = vmul.f32 %v1421_v18, %v804_v40 }
 0x57d   :  { %808 = vrot.lane.b32.xlu0 %v806_v41, %s1690_s26 }
 0x581   :  { %998 = vrot.lane.b32.xlu0 %v820_v42, %s1690_s26 }
 0x5ef   :  { %v809_v45 = vpop.permute.xlu0 %808 }
 0x5f0   :  { %812 = vst.msk [vmem:[#allocation2] sm:$0x3] %vm160_vm2, %v809_v45  ;;  %1375 = vmatmul.mubr.msk.f32.vlgmr.msra.gmra.mxu0 %vm194_vm1, %v809_v45 }
 0x5f3   :  { %v999_v59 = vpop.permute.xlu0 %998 }
 0x5f7   :  { %v1120_v46 = vld [vmem:[#allocation2] sm:$0x3] }
 0x5f8   :  { %1122 = vst.msk [vmem:[#allocation19] sm:$0x3] %vm160_vm2, %v1120_v46 }
 0x6b0   :  { %v979_v48 = vpop.f32.mrf.mxu0 }
 0x6b1   :  { %v980_v49 = vadd.f32 %v979_v48, %v907_v43 }
 0x6b2   :  { %v1376_v50 = vpop.f32.mrf.mxu0 }
 0x6b3   :  { %v989_v51 = vadd.f32 %v1206_v47, %v980_v49 }
 0x6b5   :  { %1424 = vtanh.f32 %v989_v51  ;;  %v1207_v53 = vmul.f32 -1.442695, %v989_v51 }
 0x6b7   :  { %1426 = vpow2.f32 %v1207_v53 }
 0x6c2   :  { %v1425_v52 = vpop.eup %1424 }
 0x6c3   :  { %1003 = vrot.lane.b32.xlu1 %v1425_v52, %s1694_s2 }
 0x6c4   :  { %v1427_v54 = vpop.eup %1426 }
 0x6c5   :  { %v993_v55 = vadd.f32 1.0, %v1427_v54 }
 0x6c7   :  { %1428 = vrcp.f32 %v993_v55 }
 0x6d4   :  { %v1429_v56 = vpop.eup %1428 }
 0x6d5   :  { %v1001_v60 = vmul.f32 %v1429_v56, %v999_v59 }
 0x735   :  { %v1004_v57 = vpop.permute.xlu1 %1003 }
 0x736   :  { %v1006_v58 = vmul.f32 %v1429_v56, %v1004_v57 }
 0x738   :  { %1008 = vrot.lane.b32.xlu1 %v1006_v58, %s1690_s26 }
 0x7aa   :  { %v1009_v61 = vpop.permute.xlu1 %1008 }
 0x7ab   :  { %v1011_v62 = vadd.f32 %v1009_v61, %v1001_v60 }
 0x7ad   :  { %1430 = vtanh.f32 %v1011_v62 }
 0x7ba   :  { %v1431_v6 = vpop.eup %1430 }
 0x7bb   :  { %1014 = vrot.lane.b32.xlu0 %v1431_v6, %s1694_s2  ;;  %s1143_s2 = sshll.u32 %s1704_s11, 4  ;;  %s1144_s2 = int_to_ptr.vmem [resolvable:$true] %s1143_s2 }
 0x7bc   :  { %s1592_s8 = scalar_lea.vmem %s1144_s2, 64  ;;  %p1597_p13 = scmp.lt.s32.totalorder %s1144_s2, %s1144_s2 }
 0x7bd   :  { %p1593_p12 = scmp.ne.s32.totalorder %s1144_s2, %s1592_s8  ;;  %p1598_p0 = scmp.lt.s32.totalorder %s1592_s8, %s1592_s8 }
 0x7bf   :  { %814 = vrot.lane.b32.xlu0 %v1908_v24, %s1703_s18  ;;  %p1599_p1 = por %p1598_p0, %p1597_p13 }
 0x7c1   :  { %p1600_p2 = pnand %p1599_p1, %p1593_p12 }
 0x82d   :  { %v1015_v7 = vpop.permute.xlu0 %1014 }
 0x82e   :  { %v1017_v8 = vmul.f32 %v1429_v56, %v1015_v7 }
 0x830   :  { %1019 = vrot.lane.b32.xlu1 %v1017_v8, %s1690_s26 }
 0x831   :  { %v815_v9 = vpop.permute.xlu0 %814 }
 0x832   :  { %817 = vst.msk [vmem:[#allocation3] sm:$0x3] %vm160_vm2, %v815_v9 }
 0x834   :  { %1024 = vrot.lane.b32.xlu1 %v1011_v62, %s1703_s18 }
 0x839   :  { %v1124_v10 = vld [vmem:[#allocation3] sm:$0x3] }
 0x83a   :  { %1126 = vst.msk [vmem:[#allocation21] sm:$0x3] %vm160_vm2, %v1124_v10 }
 0x8a2   :  { %v1020_v11 = vpop.permute.xlu1 %1019 }
 0x8a3   :  { %1022 = vst.msk [vmem:[#allocation2 + $0x2] sm:$0x3] %vm160_vm2, %v1020_v11  ;;  %1386 = vmatmul.mubr.msk.f32.vlgmr.msra.gmra.mxu1 %vm194_vm1, %v1020_v11 }
 0x8a6   :  { %v1025_v0 = vpop.permute.xlu1 %1024 }
 0x8a7   :  { %1027 = vst.msk [vmem:[#allocation3 + $0x2] sm:$0x3] %vm160_vm2, %v1025_v0 }
 0x8aa   :  { %v1121_v12 = vld [vmem:[#allocation2 + $0x2] sm:$0x3] }
 0x8ab   :  { %1123 = vst.msk [vmem:[#allocation19 + $0x2] sm:$0x3] %vm160_vm2, %v1121_v12 }
 0x8ae   :  { %v1125_v13 = vld [vmem:[#allocation3 + $0x2] sm:$0x3] }
 0x8af   :  { %1127 = vst.msk [vmem:[#allocation21 + $0x2] sm:$0x3] %vm160_vm2, %v1125_v13 }
 0x8b0   :  { %1603 = shalt.err (!%p1600_p2)
}
 0x8b1   :  { %1149 = dma.vmem_to_hbm [thread:$0]  %s1144_s2, 64, %s1981_s14, [#allocation20], %s1690_s26, %s1690_s26, %s1691_s27  }
 0x8b2   :  { %s1705_s10 = smov [#allocation21]   ;;  %s1706_s9 = smov [#allocation22]  }
 0x8b3   :  { %s1155_s12 = sshll.u32 %s1705_s10, 4  ;;  %s1168_s20 = sshll.u32 %s1706_s9, 4  ;;  %s1156_s12 = int_to_ptr.vmem [resolvable:$true] %s1155_s12  ;;  %s1169_s20 = int_to_ptr.vmem [resolvable:$true] %s1168_s20 }
 0x8b4   :  { %s1612_s3 = scalar_lea.vmem %s1156_s12, 64  ;;  %p1617_p4 = scmp.lt.s32.totalorder %s1156_s12, %s1156_s12 }
 0x8b5   :  { %p1613_p3 = scmp.ne.s32.totalorder %s1156_s12, %s1612_s3  ;;  %p1618_p5 = scmp.lt.s32.totalorder %s1612_s3, %s1612_s3 }
 0x8b7   :  { %p1619_p6 = por %p1618_p5, %p1617_p4 }
 0x8b9   :  { %p1620_p7 = pnand %p1619_p6, %p1613_p3 }
 0x8bb   :  { %1623 = shalt.err (!%p1620_p7)
}
 0x8bc   :  { %1161 = dma.vmem_to_hbm [thread:$0]  %s1156_s12, 64, %s1982_s15, [#allocation20], %s1690_s26, %s1690_s26, %s1691_s27  }
 0x8bd   :  { %s1632_s14 = scalar_lea.vmem %s1169_s20, 32  ;;  %p1637_p9 = scmp.lt.s32.totalorder %s1169_s20, %s1169_s20 }
 0x8be   :  { %p1633_p8 = scmp.ne.s32.totalorder %s1169_s20, %s1632_s14  ;;  %p1638_p10 = scmp.lt.s32.totalorder %s1632_s14, %s1632_s14 }
 0x8c0   :  { %p1639_p11 = por %p1638_p10, %p1637_p9 }
 0x8c2   :  { %p1640_p12 = pnand %p1639_p11, %p1633_p8 }
 0x8c4   :  { %1643 = shalt.err (!%p1640_p12)
}
 0x8c5   :  { %1171 = dma.vmem_to_hbm [thread:$0]  %s1169_s20, 32, %s1983_s16, [#allocation23]   ;;  %v1208_v14 = vld [vmem:[#allocation16] ss:$0 sm:$0xff]  ;;  %vm1115_vm7 = vcmask 123904  }
 0x8c6   :  { %s1707_s28 = smov [#allocation18]  }
 0x8c7   :  { %s1134_s7 = sshll.u32 %s1707_s28, 4  ;;  %s1135_s7 = int_to_ptr.vmem [resolvable:$true] %s1134_s7 }
 0x8c8   :  { %s1652_s15 = scalar_lea.vmem %s1135_s7, 32  ;;  %p1657_p0 = scmp.lt.s32.totalorder %s1135_s7, %s1135_s7 }
 0x8c9   :  { %p1653_p13 = scmp.ne.s32.totalorder %s1135_s7, %s1652_s15  ;;  %p1658_p1 = scmp.lt.s32.totalorder %s1652_s15, %s1652_s15 }
 0x8cb   :  { %p1659_p2 = por %p1658_p1, %p1657_p0 }
 0x8cd   :  { %p1660_p3 = pnand %p1659_p2, %p1653_p13 }
 0x963   :  { %v1111_v15 = vpop.f32.mrf.mxu1 }
 0x964   :  { %v1112_v16 = vadd.f32 %v1208_v14, %v1111_v15 }
 0x965   :  { %v1387_v17 = vpop.f32.mrf.mxu1 }
 0x966   :  { %1116 = vst.msk [vmem:[#allocation18] sm:$0x3] %vm1115_vm7, %v1112_v16 }
 0x967   :  { %1663 = shalt.err (!%p1660_p3)
}
 0x968   :  { %1137 = dma.vmem_to_hbm [thread:$0]  %s1135_s7, 32, %s1980_s13, [#allocation6]  }
 0x969   :  { %1682 = dma.done.wait [#allocation6], 32  }
 0x96a   :  { %1683 = vsyncadd [#allocation6], 4294967264 }
 0x96b   :  { %1684 = dma.done.wait [#allocation20], 128  }
 0x96c   :  { %1685 = vsyncadd [#allocation20], 4294967168 }
 0x96d   :  { %1686 = dma.done.wait [#allocation23], 32  }
 0x96e   :  { %1687 = vsyncadd [#allocation23], 4294967264 }
 0x96f   :  { %1184 = vsyncpa [#allocation5], 1 }
 0x970   :  { %1185 = vsyncpa [#allocation8], 1 }
 0x971   :  { %1186 = vsyncpa [#allocation11], 1 }
 0x972   :  { %1187 = vsyncpa [#allocation14], 1 }
 0x973   :  { %1188 = vsyncpa [#allocation17], 1 }
 0x974   :  { %1189 = vsyncpa [#allocation6], 1 }
 0x975   :  { %1190 = vsyncpa [#allocation20], 1 }
 0x976   :  { %1191 = vsyncpa [#allocation23], 1 }

</bundles_post_ra>
